<compile_context>
chip_gen: v5e
topology: v5e:2x2
jax: 0.10.0
libtpu: 0.0.40
codegen_flags: <defaults>
</compile_context>

<pallas_src>
import jax
import jax.numpy as jnp
from jax.experimental import pallas as pl
from jax.experimental.pallas import tpu as pltpu


# ---------------------------------------------------------------------------
# tile sizing
# ---------------------------------------------------------------------------

def _vmem_capacity_bytes():
    """Physical VMEM per TensorCore (falls back to the smallest, v7x-class)."""
    try:
        return int(pltpu.get_tpu_info().vmem_capacity_bytes)
    except Exception:
        return 64 * 1024 * 1024


def _choose_block_b(batch, num_classes, itemsize, chunk_c, mult, vmem_cap):
    """Byte-based batch-tile size.

    Budgets the double-buffered native-dtype logit stream plus ~4 f32-sized
    per-chunk intermediate slabs (f32 cast, exp, iota, select temp) per row.
    """
    if vmem_cap <= 64 * 1024 * 1024:          # v7x-class: 64 MiB / TC
        budget = 8 * 1024 * 1024
    else:                                     # v5e / v6e: 128 MiB
        budget = 24 * 1024 * 1024
    per_row = 2 * num_classes * itemsize + 4 * chunk_c * 4
    bb = max(mult, (budget // per_row) // mult * mult)
    rounded_batch = ((batch + mult - 1) // mult) * mult
    return min(bb, rounded_batch)


def _choose_chunk_c(num_classes):
    """Class-chunk width: full width for small C, lane-aligned 2048 otherwise."""
    if num_classes <= 2048:
        return num_classes
    return 2048


# ---------------------------------------------------------------------------
# kernel
# ---------------------------------------------------------------------------

def _make_ce_kernel(batch, block_b, num_classes, chunk_c, needs_mask):
    num_chunks = (num_classes + chunk_c - 1) // chunk_c

    def kernel(logits_ref, targets_ref, wt_ref, part_ref):
        t = targets_ref[...]                   # (bb, 1) int32
        wt = wt_ref[...]                       # (bb, 1) f32 (pre-gathered w[t])

        m_run = None                           # running row max          (f32)
        s_run = None                           # running sum of exp       (f32)
        xt_run = jnp.zeros((block_b, 1), jnp.float32)   # running x[target]

        # Unrolled (static) loop over lane-aligned class chunks: bounds the
        # f32 intermediates to one (block_b, chunk_c) slab at a time.
        for c in range(num_chunks):
            c0 = c * chunk_c
            cw = min(chunk_c, num_classes - c0)
            xc = logits_ref[:, c0:c0 + cw]     # native dtype (bb, cw), static view

            # row max in the native dtype (exact: pure select), cast after.
            mc = jnp.max(xc, axis=-1, keepdims=True).astype(jnp.float32)

            # target-column pick via compare+select (exact in native dtype:
            # at most one column matches, so the sum is a copy).
            cls = jax.lax.broadcasted_iota(jnp.int32, (block_b, cw), 1) + c0
            picked = jnp.where(cls == t, xc, jnp.zeros_like(xc))
            xt_run = xt_run + jnp.sum(
                picked, axis=-1, keepdims=True).astype(jnp.float32)

            # exp / sum-exp path stays in f32 for accuracy.
            if c == 0:
                m_new = mc
            else:
                m_new = jnp.maximum(m_run, mc)
            p_sum = jnp.sum(jnp.exp(xc.astype(jnp.float32) - m_new),
                            axis=-1, keepdims=True)
            if c == 0:
                s_run = p_sum
            else:
                s_run = s_run * jnp.exp(m_run - m_new) + p_sum
            m_run = m_new

        nll = (m_run + jnp.log(s_run)) - xt_run                # (bb, 1)

        if needs_mask:
            # Last batch tile may be padded past `batch`; padded rows can hold
            # garbage/NaN, so SELECT them to 0 (never multiply by a mask).
            row = (jax.lax.broadcasted_iota(jnp.int32, (block_b, 1), 0)
                   + pl.program_id(0) * block_b)
            valid = row < batch
            wt = jnp.where(valid, wt, 0.0)
            nll = jnp.where(valid, nll, 0.0)

        num = jnp.sum(wt * nll)                                 # scalar
        den = jnp.sum(wt)                                       # scalar

        # Lane-dense, unmasked (1,1,128) partial: lane 0 = num, lane 1 = den.
        lane = jax.lax.broadcasted_iota(jnp.int32, (1, 1, 128), 2)
        part_ref[...] = jnp.where(
            lane == 0, num, jnp.where(lane == 1, den, jnp.float32(0.0)))

    return kernel


# ---------------------------------------------------------------------------
# wrapper
# ---------------------------------------------------------------------------

def classification_loss(outputs, targets, class_weights=None,
                        block_b=None, chunk_c=None):
    """Matches torch.nn.CrossEntropyLoss(weight=class_weights)(outputs, targets).

    outputs: (B, C) float logits (f32 or bf16, streamed in native dtype)
    targets: (B,)   integer class labels
    class_weights: optional dict {class_idx: weight} (like the torch module)
                   or a length-C sequence.  None -> plain mean reduction.
                   NOTE: class indices missing from a dict default to weight
                   1.0 (torch instead requires a full-length weight tensor).
    """
    batch, num_classes = outputs.shape
    itemsize = outputs.dtype.itemsize

    # ----- per-class weights -> per-sample weights (wrapper-side gather) -----
    if class_weights is None:
        w = jnp.ones((num_classes,), jnp.float32)
    elif isinstance(class_weights, dict):
        idx = jnp.asarray(list(class_weights.keys()), jnp.int32)
        vals = jnp.asarray(list(class_weights.values()), jnp.float32)
        w = jnp.ones((num_classes,), jnp.float32).at[idx].set(vals)
    else:
        w = jnp.asarray(class_weights, jnp.float32)

    t = targets.astype(jnp.int32)
    in_range = (t >= 0) & (t < num_classes)                 # ignore_index-like
    t_safe = jnp.clip(t, 0, num_classes - 1)
    wt = jnp.where(in_range, w[t_safe], 0.0).astype(jnp.float32)

    # ----- class-axis chunk width (lane-aligned) -----
    if chunk_c is None:
        chunk_c = _choose_chunk_c(num_classes)
    else:
        chunk_c = min(int(chunk_c), num_classes)
        if chunk_c < num_classes:
            chunk_c = max(128, (chunk_c // 128) * 128)      # lane alignment

    # ----- batch-tile size (byte-based, generation-aware) -----
    vmem_cap = _vmem_capacity_bytes()
    mult = 16 if itemsize <= 2 else 8                       # sublane packing
    if block_b is None:
        block_b = _choose_block_b(batch, num_classes, itemsize,
                                  chunk_c, mult, vmem_cap)
    else:
        block_b = max(mult, ((int(block_b) + mult - 1) // mult) * mult)
    if block_b >= batch:
        block_b = batch            # single full-extent block (no padding)

    num_blocks = pl.cdiv(batch, block_b)
    needs_mask = num_blocks * block_b != batch

    t2 = t.reshape(batch, 1)
    wt2 = wt.reshape(batch, 1)

    kernel = _make_ce_kernel(batch, block_b, num_classes, chunk_c, needs_mask)

    vmem_limit = (32 * 1024 * 1024 if vmem_cap <= 64 * 1024 * 1024
                  else 64 * 1024 * 1024)

    parts = pl.pallas_call(
        kernel,
        out_shape=jax.ShapeDtypeStruct((num_blocks, 1, 128), jnp.float32),
        grid_spec=pltpu.PrefetchScalarGridSpec(
            num_scalar_prefetch=0,
            grid=(num_blocks,),
            in_specs=[
                pl.BlockSpec((block_b, num_classes), lambda i: (i, 0)),
                pl.BlockSpec((block_b, 1), lambda i: (i, 0)),
                pl.BlockSpec((block_b, 1), lambda i: (i, 0)),
            ],
            out_specs=pl.BlockSpec((1, 1, 128), lambda i: (i, 0, 0)),
        ),
        compiler_params=pltpu.CompilerParams(
            dimension_semantics=("parallel",),   # megacore-shardable partials
            vmem_limit_bytes=vmem_limit,
        ),
    )(outputs, t2, wt2)

    num = jnp.sum(parts[:, 0, 0])
    den = jnp.sum(parts[:, 0, 1])
    return num / den


# ---------------------------------------------------------------------------
# reference + tests
# ---------------------------------------------------------------------------

def _reference_loss(outputs, targets, w):
    # pure-JAX reference (weighted cross entropy, torch semantics)
    logp = jax.nn.log_softmax(outputs.astype(jnp.float32), axis=-1)
    nll = -jnp.take_along_axis(
        logp, targets[:, None].astype(jnp.int32), axis=-1)[:, 0]
    wt = w[targets]
    return jnp.sum(wt * nll) / jnp.sum(wt)


if __name__ == "__main__":
    key = jax.random.PRNGKey(0)
    k1, k2, k3, k4, k5, k6 = jax.random.split(key, 6)

    # shapes implied by the module: (batch_size, num_classes)
    B, C = 4, 16
    outputs = jax.random.normal(k1, (B, C), dtype=jnp.float32)
    targets = jax.random.randint(k2, (B,), 0, C, dtype=jnp.int32)

    # deterministic synthetic class weights (the torch module takes a dict)
    class_weights = {i: 1.0 + 0.1 * i for i in range(C)}
    w = jnp.asarray([class_weights[i] for i in range(C)], jnp.float32)

    # weighted path
    loss = jax.block_until_ready(classification_loss(outputs, targets, class_weights))
    ref = _reference_loss(outputs, targets, w)
    assert jnp.allclose(loss, ref, atol=1e-5, rtol=1e-5), (loss, ref)

    # unweighted (plain mean) path
    loss_u = jax.block_until_ready(classification_loss(outputs, targets, None))
    ref_u = _reference_loss(outputs, targets, jnp.ones((C,), jnp.float32))
    assert jnp.allclose(loss_u, ref_u, atol=1e-5, rtol=1e-5), (loss_u, ref_u)

    # multi-tile grid with a padded last tile (B not a multiple of block_b)
    B2, C2 = 20, 24
    out2 = jax.random.normal(k3, (B2, C2), dtype=jnp.float32)
    tgt2 = jax.random.randint(k4, (B2,), 0, C2, dtype=jnp.int32)
    loss2 = jax.block_until_ready(classification_loss(out2, tgt2, None, block_b=8))
    ref2 = _reference_loss(out2, tgt2, jnp.ones((C2,), jnp.float32))
    assert jnp.allclose(loss2, ref2, atol=1e-5, rtol=1e-5), (loss2, ref2)

    # native-bf16 logits streamed straight through the kernel (no wrapper cast)
    out_bf16 = outputs.astype(jnp.bfloat16)
    loss_bf = jax.block_until_ready(classification_loss(out_bf16, targets, class_weights))
    ref_bf = _reference_loss(out_bf16, targets, w)
    assert jnp.allclose(loss_bf, ref_bf, atol=1e-3, rtol=1e-3), (loss_bf, ref_bf)

    # class-axis chunked path (C > chunk_c) combined with a padded batch tile
    B3, C3 = 24, 256
    out3 = jax.random.normal(k5, (B3, C3), dtype=jnp.float32)
    tgt3 = jax.random.randint(k6, (B3,), 0, C3, dtype=jnp.int32)
    loss3 = jax.block_until_ready(
        classification_loss(out3, tgt3, None, block_b=16, chunk_c=128))
    ref3 = _reference_loss(out3, tgt3, jnp.ones((C3,), jnp.float32))
    assert jnp.allclose(loss3, ref3, atol=1e-5, rtol=1e-5), (loss3, ref3)

    print("KERNEL_OK")
</pallas_src>

<mosaic_0001>
module attributes {stable_mosaic.version = 11 : i64} {
  func.func @kernel(%arg0: i32, %arg1: memref<4x16xf32, #tpu.memory_space<vmem>>, %arg2: memref<4x1xi32, #tpu.memory_space<vmem>>, %arg3: memref<4x1xf32, #tpu.memory_space<vmem>>, %arg4: memref<1x1x128xf32, #tpu.memory_space<vmem>>) attributes {dimension_semantics = [#tpu.dimension_semantics<parallel>], iteration_bounds = array<i64: 1>, scalar_prefetch = 0 : i64, scratch_operands = 0 : i64, tpu.core_type = #tpu.core_type<tc>, window_params = [{transform_indices = @transform_0, window_bounds = array<i64: 4, 16>}, {transform_indices = @transform_1, window_bounds = array<i64: 4, 1>}, {transform_indices = @transform_2, window_bounds = array<i64: 4, 1>}, {transform_indices = @transform_3, window_bounds = array<i64: 1, 1, 128>}]} {
    %c0 = arith.constant 0 : index
    %c0_0 = arith.constant 0 : index
    %0 = vector.load %arg2[%c0, %c0_0] : memref<4x1xi32, #tpu.memory_space<vmem>>, vector<4x1xi32>
    %c0_1 = arith.constant 0 : index
    %c0_2 = arith.constant 0 : index
    %1 = vector.load %arg3[%c0_1, %c0_2] : memref<4x1xf32, #tpu.memory_space<vmem>>, vector<4x1xf32>
    %cst = arith.constant 0.000000e+00 : f32
    %2 = vector.broadcast %cst : f32 to vector<4x1xf32>
    %c0_3 = arith.constant 0 : index
    %c0_4 = arith.constant 0 : index
    %3 = vector.load %arg1[%c0_3, %c0_4] : memref<4x16xf32, #tpu.memory_space<vmem>>, vector<4x16xf32>
    %cst_5 = arith.constant dense<0xFF800000> : vector<4xf32>
    %4 = vector.multi_reduction <maximumf>, %3, %cst_5 [1] : vector<4x16xf32> to vector<4xf32>
    %5 = vector.shape_cast %4 : vector<4xf32> to vector<4x1xf32>
    %6 = tpu.iota {dimensions = array<i32: 1>} : vector<4x16xi32>
    %c0_i32 = arith.constant 0 : i32
    %7 = vector.broadcast %c0_i32 : i32 to vector<4x16xi32>
    %8 = arith.addi %6, %7 : vector<4x16xi32>
    %9 = vector.broadcast %0 : vector<4x1xi32> to vector<4x16xi32>
    %10 = arith.cmpi eq, %8, %9 : vector<4x16xi32>
    %cst_6 = arith.constant 0.000000e+00 : f32
    %11 = vector.broadcast %cst_6 : f32 to vector<4x16xf32>
    %12 = arith.select %10, %3, %11 : vector<4x16xi1>, vector<4x16xf32>
    %cst_7 = arith.constant dense<0.000000e+00> : vector<4xf32>
    %13 = vector.multi_reduction <add>, %12, %cst_7 [1] : vector<4x16xf32> to vector<4xf32>
    %14 = vector.shape_cast %13 : vector<4xf32> to vector<4x1xf32>
    %15 = arith.addf %2, %14 : vector<4x1xf32>
    %16 = vector.broadcast %5 : vector<4x1xf32> to vector<4x16xf32>
    %17 = arith.subf %3, %16 : vector<4x16xf32>
    %18 = math.exp %17 : vector<4x16xf32>
    %cst_8 = arith.constant dense<0.000000e+00> : vector<4xf32>
    %19 = vector.multi_reduction <add>, %18, %cst_8 [1] : vector<4x16xf32> to vector<4xf32>
    %20 = vector.shape_cast %19 : vector<4xf32> to vector<4x1xf32>
    %21 = math.log %20 : vector<4x1xf32>
    %22 = arith.addf %5, %21 : vector<4x1xf32>
    %23 = arith.subf %22, %15 : vector<4x1xf32>
    %24 = arith.mulf %1, %23 : vector<4x1xf32>
    %25 = vector.shape_cast %24 : vector<4x1xf32> to vector<1x4x1xf32>
    %cst_9 = arith.constant dense<0.000000e+00> : vector<1xf32>
    %26 = vector.multi_reduction <add>, %25, %cst_9 [1, 2] : vector<1x4x1xf32> to vector<1xf32>
    %27 = vector.shape_cast %26 : vector<1xf32> to vector<1x1x1xf32>
    %28 = vector.extract %27[0, 0, 0] : f32 from vector<1x1x1xf32>
    %29 = vector.shape_cast %1 : vector<4x1xf32> to vector<1x4x1xf32>
    %cst_10 = arith.constant dense<0.000000e+00> : vector<1xf32>
    %30 = vector.multi_reduction <add>, %29, %cst_10 [1, 2] : vector<1x4x1xf32> to vector<1xf32>
    %31 = vector.shape_cast %30 : vector<1xf32> to vector<1x1x1xf32>
    %32 = vector.extract %31[0, 0, 0] : f32 from vector<1x1x1xf32>
    %33 = tpu.iota {dimensions = array<i32: 2>} : vector<1x1x128xi32>
    %c0_i32_11 = arith.constant 0 : i32
    %34 = vector.broadcast %c0_i32_11 : i32 to vector<1x1x128xi32>
    %35 = arith.cmpi eq, %33, %34 : vector<1x1x128xi32>
    %c1_i32 = arith.constant 1 : i32
    %36 = vector.broadcast %c1_i32 : i32 to vector<1x1x128xi32>
    %37 = arith.cmpi eq, %33, %36 : vector<1x1x128xi32>
    %cst_12 = arith.constant 0.000000e+00 : f32
    %38 = vector.broadcast %32 : f32 to vector<1x1x128xf32>
    %39 = vector.broadcast %cst_12 : f32 to vector<1x1x128xf32>
    %40 = arith.select %37, %38, %39 : vector<1x1x128xi1>, vector<1x1x128xf32>
    %41 = vector.broadcast %28 : f32 to vector<1x1x128xf32>
    %42 = arith.select %35, %41, %40 : vector<1x1x128xi1>, vector<1x1x128xf32>
    %c0_13 = arith.constant 0 : index
    %c0_14 = arith.constant 0 : index
    %c0_15 = arith.constant 0 : index
    %43 = vector.load %arg4[%c0_13, %c0_14, %c0_15] : memref<1x1x128xf32, #tpu.memory_space<vmem>>, vector<1x1x128xf32>
    tpu.vector_store %arg4[%c0_13, %c0_14, %c0_15], %42 {strides = array<i32>} : memref<1x1x128xf32, #tpu.memory_space<vmem>>, vector<1x1x128xf32>,
    return
  }
  func.func @transform_0(%arg0: i32) -> (i32, i32) {
    %c0_i32 = arith.constant 0 : i32
    %c0_i32_0 = arith.constant 0 : i32
    return %arg0, %c0_i32 : i32, i32
  }
  func.func @transform_1(%arg0: i32) -> (i32, i32) {
    %c0_i32 = arith.constant 0 : i32
    %c0_i32_0 = arith.constant 0 : i32
    return %arg0, %c0_i32 : i32, i32
  }
  func.func @transform_2(%arg0: i32) -> (i32, i32) {
    %c0_i32 = arith.constant 0 : i32
    %c0_i32_0 = arith.constant 0 : i32
    return %arg0, %c0_i32 : i32, i32
  }
  func.func @transform_3(%arg0: i32) -> (i32, i32, i32) {
    %c0_i32 = arith.constant 0 : i32
    %c0_i32_0 = arith.constant 0 : i32
    %c0_i32_1 = arith.constant 0 : i32
    return %arg0, %c0_i32, %c0_i32_0 : i32, i32, i32
  }
}

</mosaic_0001>

<bundles_post_ra>
// kernel: tpu_custom_call.1
= control target key start
LH: loop header
LB: loop body
LE: loop exit
PB: predicated region body
PF: predicated region fallthrough
CT: control target
= control target key end

     0   :  { %vm18_vm0 = vcmask 125952   ;;  %v125_v2 = vmov 0   ;;  %s162_s0 = inlined_call_operand.vmem [shape: f32[4,16], index: 0, kind: input, shape index: {}]   ;;  %s163_s1 = inlined_call_operand.vmem [shape: s32[4,1], index: 1, kind: input, shape index: {}]   ;;  %s164_s2 = inlined_call_operand.vmem [shape: f32[4,1], index: 2, kind: input, shape index: {}]   ;;  %s165_s3 = inlined_call_operand.hbm [shape: f32[1,1,128], index: 3, kind: output, shape index: {}]  }
   0x1   :  { %v17_v0 = vld [vmem:[%s162_s0] sm:$0xf]  ;;  %94 = vset.pattern.permute.xlu0 %v125_v2 }
   0x2   :  { %v19_v1 = vsel %vm18_vm0, %v17_v0, -inf }
   0x3   :  { %8 = vsyncpa [#allocation3], 0  ;;  %20 = vmax.xlane.f32.xlu0 %v19_v1  ;;  %v15_v3 = vld [vmem:[%s163_s1] sm:$0xf]  ;;  %v22_v9 = vlaneseq  ;;  %vm44_vm2 = vcmask 3072   ;;  %s79_s20 = sshll.u32 %s165_s3, 4  ;;  %s80_s20 = int_to_ptr.hbm [resolvable:$true] %s79_s20 }
   0x4   :  { %v16_v19 = vld [vmem:[%s164_s2] sm:$0xf]  ;;  %s126_s2 = smov [#allocation2]  }
   0x5   :  { %v23_v10 = vand.u32 127, %v22_v9  ;;  %v55_v23 = vsel %vm44_vm2, %v16_v19, 0.0  ;;  %s77_s16 = sshll.u32 %s126_s2, 4  ;;  %s78_s16 = int_to_ptr.vmem [resolvable:$true] %s77_s16 }
   0x7   :  { %vm66_vm3 = vcmp.eq.s32.totalorder %v23_v10, 1  ;;  %vm65_vm4 = vcmp.eq.s32.totalorder %v23_v10, 0 }
  0x17   :  { %25 = vperm.xlu0 %94, %v15_v3  }
  0x76   :  { %v21_v4 = vpop.xlane.xlu0 %20 }
  0x77   :  { %v33_v5 = vsub.f32 %v17_v0, %v21_v4 }
  0x79   :  { %v34_v6 = vmul.f32 1.442695, %v33_v5 }
  0x7b   :  { %95 = vpow2.f32 %v34_v6 }
  0x81   :  { %v96_v7 = vpop.eup %95 }
  0x82   :  { %v36_v8 = vsel %vm18_vm0, %v96_v7, 0.0 }
  0x83   :  { %37 = vadd.xlane.f32.xlu1 %v36_v8 }
  0x89   :  { %v26_v11 = vpop.permute.xlu0 %25 }
  0x8a   :  { %vm27_vm1 = vcmp.eq.s32.totalorder %v23_v10, %v26_v11 }
  0x8b   :  { %v28_v12 = vsel %vm27_vm1, %v17_v0, 0.0 }
  0x8c   :  { %v29_v13 = vsel %vm18_vm0, %v28_v12, 0.0 }
  0x8d   :  { %30 = vadd.xlane.f32.xlu1 %v29_v13 }
  0xf6   :  { %v38_v14 = vpop.xlane.xlu1 %37 }
  0xf7   :  { %97 = vlog2.f32 %v38_v14 }
  0xfd   :  { %v98_v15 = vpop.eup %97 }
  0xfe   :  { %v40_v16 = vmul.f32 0.6931472, %v98_v15 }
 0x100   :  { %v41_v17 = vadd.f32 %v40_v16, %v21_v4  ;;  %v31_v18 = vpop.xlane.xlu1 %30 }
 0x102   :  { %v42_v20 = vsub.f32 %v41_v17, %v31_v18 }
 0x104   :  { %v43_v21 = vmul.f32 %v42_v20, %v16_v19 }
 0x106   :  { %v45_v22 = vsel %vm44_vm2, %v43_v21, 0.0 }
 0x107   :  { %46 = vadd.xlane.f32.xlu2 %v45_v22 }
 0x10f   :  { %56 = vadd.xlane.f32.xlu2 %v55_v23 }
 0x17a   :  { %v47_v24 = vpop.xlane.xlu2 %46 }
 0x17b   :  { %v48_v25 = vrot.slane %v47_v24, 4 }
 0x17d   :  { %v49_v26 = vadd.f32 %v48_v25, %v47_v24 }
 0x17f   :  { %v50_v27 = vrot.slane %v49_v26, 2 }
 0x181   :  { %v51_v28 = vadd.f32 %v50_v27, %v49_v26 }
 0x182   :  { %v57_v29 = vpop.xlane.xlu2 %56 }
 0x183   :  { %v58_v30 = vrot.slane %v57_v29, 4  ;;  %v52_v31 = vrot.slane %v51_v28, 1 }
 0x185   :  { %v59_v32 = vadd.f32 %v58_v30, %v57_v29  ;;  %v53_v33 = vadd.f32 %v52_v31, %v51_v28 }
 0x187   :  { %v60_v34 = vrot.slane %v59_v32, 2  ;;  %88 = vpush %v53_v33 }
 0x189   :  { %v61_v35 = vadd.f32 %v60_v34, %v59_v32 }
 0x18b   :  { %v62_v36 = vrot.slane %v61_v35, 1 }
 0x18d   :  { %v63_v37 = vadd.f32 %v62_v36, %v61_v35 }
 0x18f   :  { %90 = vpush %v63_v37 }
 0x1b8   :  { %s89_s17 = spop %88 }
 0x1b9   :  { %v69_v39 = vstv %s89_s17 }
 0x1c0   :  { %s91_s21 = spop %90 }
 0x1c1   :  { %v67_v38 = vstv %s91_s21 }
 0x1c2   :  { %v68_v40 = vsel %vm66_vm3, %v67_v38, 0.0 }
 0x1c3   :  { %v70_v41 = vsel %vm65_vm4, %v69_v39, %v68_v40 }
 0x1c4   :  { %71 = vst [vmem:[#allocation2] sm:$0x1] %v70_v41 }
 0x1c5   :  { %82 = dma.vmem_to_hbm [thread:$0]  %s78_s16, 16, %s80_s20, [#allocation3]  }
 0x1c6   :  { %123 = dma.done.wait [#allocation3], 16  }
 0x1c7   :  { %124 = vsyncadd [#allocation3], 4294967280 }
 0x1c8   :  { %87 = vsyncpa [#allocation3], 1 }

</bundles_post_ra>
